<compile_context>
chip_gen: v7x
topology: tpu7x:2x2x1
jax: 0.10.0
libtpu: 0.0.40
codegen_flags: <defaults>
</compile_context>

<pallas_src>
import jax
import jax.numpy as jnp
from jax import lax
from jax.experimental import pallas as pl
from jax.experimental.pallas import tpu as pltpu


def _linear_normalize_kernel(x_ref, w_ref, b_ref, o_ref):
    """Fused Linear + row-wise L2 normalize for one batch tile.

    x_ref: (TM, H) f32   w_ref: (H, F) bf16   b_ref: (1, F) f32   o_ref: (TM, F) f32
    """
    # Cast activations to bf16 in VMEM (VALU, cheap) and run the MXU matmul
    # with f32 accumulation.
    x_bf = x_ref[...].astype(jnp.bfloat16)
    y = jnp.dot(x_bf, w_ref[...], preferred_element_type=jnp.float32)
    y = y + b_ref[...]                                    # (TM, F), f32

    # F.normalize(dim=1, p=2, eps=1e-12):
    #   y / max(||y||, 1e-12)  ==  y * rsqrt(max(sum(y^2), 1e-24))   (sqrt monotone)
    sq_sum = jnp.sum(y * y, axis=1, keepdims=True)        # (TM, 1)
    inv_norm = lax.rsqrt(jnp.maximum(sq_sum, 1e-24))      # EUP rsqrt (free slot)
    o_ref[...] = (y * inv_norm).astype(o_ref.dtype)


def model_with_normalize(x, w, b, *, tm=128):
    """x: (B, H), w: (H, F), b: (1, F)  ->  (B, F) f32, rows L2-normalized.

    tm: batch tile height. 128 is safe everywhere (v5e MXU granularity);
    use 256-512 on v6e/v7x for large B.
    """
    B, H = x.shape
    Hw, F = w.shape
    assert H == Hw and b.shape == (1, F)
    # Keep the MXU/store path lane-dense; pad H/F in the caller otherwise.
    assert H % 128 == 0 and F % 128 == 0, "pad H and F to multiples of 128"

    # Weights: bf16 (halves resident VMEM and the one-time HBM fetch).
    # Activations x are passed through at their native dtype and cast in-kernel.
    w_bf = w.astype(jnp.bfloat16)
    b_f32 = b.astype(jnp.float32)

    # Pad batch to a multiple of the tile height. Padded (zero) rows produce
    # y = b, get normalized, and are sliced off below -- no NaN (max with eps).
    n_tiles = pl.cdiv(B, tm)
    Bp = n_tiles * tm
    if Bp != B:
        x = jnp.pad(x, ((0, Bp - B), (0, 0)))

    cost = pl.CostEstimate(
        flops=2 * Bp * H * F,
        transcendentals=Bp,                                # one rsqrt per row
        bytes_accessed=Bp * H * x.dtype.itemsize + H * F * 2 + F * 4 + Bp * F * 4,
    )

    out = pl.pallas_call(
        _linear_normalize_kernel,
        out_shape=jax.ShapeDtypeStruct((Bp, F), jnp.float32),
        grid_spec=pl.GridSpec(
            grid=(n_tiles,),
            in_specs=[
                pl.BlockSpec((tm, H), lambda i: (i, 0)),   # x: walks the batch
                pl.BlockSpec((H, F), lambda i: (0, 0)),    # W: resident across tiles
                pl.BlockSpec((1, F), lambda i: (0, 0)),    # b: resident across tiles
            ],
            out_specs=pl.BlockSpec((tm, F), lambda i: (i, 0)),
        ),
        compiler_params=pltpu.CompilerParams(
            dimension_semantics=("parallel",),             # megacore / v7x dual-TC
            vmem_limit_bytes=48 * 1024 * 1024,             # safe under v7x 64 MiB
        ),
        cost_estimate=cost,
    )(x, w_bf, b_f32)

    return out[:B] if Bp != B else out


def _reference(x, w, b):
    # Same bf16-quantized operands as the kernel, f32 math, to isolate kernel error.
    xb = x.astype(jnp.bfloat16).astype(jnp.float32)
    wb = w.astype(jnp.bfloat16).astype(jnp.float32)
    y = jnp.dot(xb, wb, preferred_element_type=jnp.float32) + b.astype(jnp.float32)
    nrm = jnp.maximum(jnp.sqrt(jnp.sum(y * y, axis=1, keepdims=True)), 1e-12)
    return y / nrm


if __name__ == "__main__":
    # Small shapes consistent with the forward (B, H) -> (B, F).
    # B is intentionally not a multiple of the tile to exercise padding and a
    # multi-step batch grid (200 -> 256 padded -> 2 tiles of 128).
    B, H, F = 200, 256, 256

    key = jax.random.PRNGKey(0)
    kx, kw, kb = jax.random.split(key, 3)

    x = jax.random.normal(kx, (B, H), dtype=jnp.float32)
    w = jax.random.normal(kw, (H, F), dtype=jnp.float32) * (H ** -0.5)
    b = jax.random.normal(kb, (1, F), dtype=jnp.float32) * 0.01

    out = jax.block_until_ready(model_with_normalize(x, w, b, tm=128))

    ref = _reference(x, w, b)
    assert out.shape == (B, F)
    assert jnp.allclose(out, ref, atol=1e-4, rtol=1e-4)
    # Rows should be unit-norm.
    assert jnp.allclose(jnp.linalg.norm(out, axis=1), 1.0, atol=1e-4)

    print("KERNEL_OK")
</pallas_src>

<mosaic_0001>
module attributes {stable_mosaic.version = 11 : i64} {
  func.func @_linear_normalize_kernel(%arg0: i32, %arg1: memref<128x256xf32, #tpu.memory_space<vmem>>, %arg2: memref<256x256xbf16, #tpu.memory_space<vmem>>, %arg3: memref<1x256xf32, #tpu.memory_space<vmem>>, %arg4: memref<128x256xf32, #tpu.memory_space<vmem>>) attributes {dimension_semantics = [#tpu.dimension_semantics<parallel>], iteration_bounds = array<i64: 2>, scalar_prefetch = 0 : i64, scratch_operands = 0 : i64, tpu.core_type = #tpu.core_type<tc>, window_params = [{transform_indices = @transform_0, window_bounds = array<i64: 128, 256>}, {pipeline_mode = #tpu.pipeline_mode<synchronous>, transform_indices = @transform_1, window_bounds = array<i64: 256, 256>}, {pipeline_mode = #tpu.pipeline_mode<synchronous>, transform_indices = @transform_2, window_bounds = array<i64: 1, 256>}, {transform_indices = @transform_3, window_bounds = array<i64: 128, 256>}]} {
    %c0 = arith.constant 0 : index
    %c0_0 = arith.constant 0 : index
    %0 = vector.load %arg1[%c0, %c0_0] : memref<128x256xf32, #tpu.memory_space<vmem>>, vector<128x256xf32>
    %1 = arith.truncf %0 : vector<128x256xf32> to vector<128x256xbf16>
    %c0_1 = arith.constant 0 : index
    %c0_2 = arith.constant 0 : index
    %2 = vector.load %arg2[%c0_1, %c0_2] : memref<256x256xbf16, #tpu.memory_space<vmem>>, vector<256x256xbf16>
    %cst = arith.constant dense<0.000000e+00> : vector<128x256xf32>
    %3 = tpu.matmul %1, %2, %cst {dimension_numbers = #tpu.dot_dimension_numbers<[1], [0], [0], [1], [0, 0, 1, 1], [], []>} : vector<128x256xbf16>, vector<256x256xbf16>, vector<128x256xf32> -> vector<128x256xf32>
    %c0_3 = arith.constant 0 : index
    %c0_4 = arith.constant 0 : index
    %4 = vector.load %arg3[%c0_3, %c0_4] : memref<1x256xf32, #tpu.memory_space<vmem>>, vector<1x256xf32>
    %5 = vector.broadcast %4 : vector<1x256xf32> to vector<128x256xf32>
    %6 = arith.addf %3, %5 : vector<128x256xf32>
    %7 = arith.mulf %6, %6 : vector<128x256xf32>
    %cst_5 = arith.constant dense<0.000000e+00> : vector<128xf32>
    %8 = vector.multi_reduction <add>, %7, %cst_5 [1] : vector<128x256xf32> to vector<128xf32>
    %9 = vector.shape_cast %8 : vector<128xf32> to vector<128x1xf32>
    %cst_6 = arith.constant 1.000000e-24 : f32
    %10 = vector.broadcast %cst_6 : f32 to vector<128x1xf32>
    %11 = arith.maximumf %9, %10 : vector<128x1xf32>
    %12 = math.rsqrt %11 : vector<128x1xf32>
    %13 = vector.broadcast %12 : vector<128x1xf32> to vector<128x256xf32>
    %14 = arith.mulf %6, %13 : vector<128x256xf32>
    %c0_7 = arith.constant 0 : index
    %c0_8 = arith.constant 0 : index
    %15 = vector.load %arg4[%c0_7, %c0_8] : memref<128x256xf32, #tpu.memory_space<vmem>>, vector<128x256xf32>
    tpu.vector_store %arg4[%c0_7, %c0_8], %14 {strides = array<i32>} : memref<128x256xf32, #tpu.memory_space<vmem>>, vector<128x256xf32>,
    return
  }
  func.func @transform_0(%arg0: i32) -> (i32, i32) {
    %c0_i32 = arith.constant 0 : i32
    %c0_i32_0 = arith.constant 0 : i32
    return %arg0, %c0_i32 : i32, i32
  }
  func.func @transform_1(%arg0: i32) -> (i32, i32) {
    %c0_i32 = arith.constant 0 : i32
    %c0_i32_0 = arith.constant 0 : i32
    %c0_i32_1 = arith.constant 0 : i32
    return %c0_i32, %c0_i32_0 : i32, i32
  }
  func.func @transform_2(%arg0: i32) -> (i32, i32) {
    %c0_i32 = arith.constant 0 : i32
    %c0_i32_0 = arith.constant 0 : i32
    %c0_i32_1 = arith.constant 0 : i32
    return %c0_i32, %c0_i32_0 : i32, i32
  }
  func.func @transform_3(%arg0: i32) -> (i32, i32) {
    %c0_i32 = arith.constant 0 : i32
    %c0_i32_0 = arith.constant 0 : i32
    return %arg0, %c0_i32 : i32, i32
  }
}

</mosaic_0001>

<bundles_post_ra>
// kernel: tpu_custom_call.1
= control target key start
LH: loop header
LB: loop body
LE: loop exit
PB: predicated region body
PF: predicated region fallthrough
CT: control target
= control target key end

     0   :  { %8 = vsyncpa [#allocation3], 0  ;;  %s1707_s0 = inlined_call_operand.hbm [shape: f32[256,256], index: 0, kind: input, shape index: {}]   ;;  %s1708_s1 = inlined_call_operand.hbm [shape: bf16[256,256], index: 1, kind: input, shape index: {}]   ;;  %s1709_s2 = inlined_call_operand.vmem [shape: f32[1,256], index: 2, kind: input, shape index: {}]   ;;  %s1710_s3 = inlined_call_operand.hbm [shape: f32[256,256], index: 3, kind: output, shape index: {}]  }
   0x1   :  { %10 = vsyncpa [#allocation3 + $0x1], 0 }
   0x2   :  { %11 = vsyncpa [#allocation6], 0 }
   0x3   :  { %12 = vsyncpa [#allocation4], 0 }
   0x4   :  { %14 = vsyncpa [#allocation4 + $0x1], 0  ;;  %s1234_s12 = smov 0   ;;  %s1236_s13 = smov 0  }
   0x5   :  { %s1238_s14 = smov 0   ;;  %s1240_s15 = smov 0  }
   0x6 LB: > { %s1255_s16 = sadd.s32 4294967295, %s1203_s15   ;;  %s846_s17 = sadd.s32 4294967294, %s1203_s15   ;;  %s1203_s15 = sphi %s1240_s15, %s1730_s15   ;;  %s1199_s14 = sphi %s1238_s14, %s1729_s14   ;;  %s1195_s13 = sphi %s1236_s13, %s1728_s13   ;;  %s1191_s12 = sphi %s1234_s12, %s1727_s12  }
   0x7   : > { %p40_p0 = scmp.ne.s32.totalorder %s1195_s13, %s1191_s12  ;;  %p1711_p1 = scmp.eq.s32.totalorder %s1255_s16, 0 }
   0x8   : > { %p112_p3 = scmp.eq.s32.totalorder %s846_s17, 1  ;;  %p847_p5 = scmp.ge.s32.totalorder %s1203_s15, 1 }
   0x9   : > { %p1264_p4 = por %p1711_p1, %p40_p0  ;;  %p119_p7 = scmp.lt.s32.totalorder %s1203_s15, 3 }
   0xa   : > { %p1269_p6 = por %p112_p3, %p40_p0  ;;  %s1205_s21 = smov [#allocation5]  }
   0xb   : > { %s1714_s18 = scalar_select %p1264_p4, 1, 0 }
   0xc   : > { %s1715_s19 = scalar_select %p1269_p6, 1, 0 }
   0xd   : > { %p1274_p8 = pnand %p847_p5, %p119_p7  ;;  %s131_s22 = sshll.u32 %s1205_s21, 4  ;;  %s1278_s22 = int_to_ptr.vmem [resolvable:$true] %s131_s22 }
   0xe   : > { %s1290_s24 = sadd.s32 1, %s1203_s15   ;;  %s27_s25 = sadd.s32 1, %s1199_s14 }
   0xf   : > { %s1716_s20 = scalar_select %p1274_p8, 1, 0 }
  0x10   : > { %p940_p9 = pneg %p1274_p8  ;;  %s24_s26 = ssub.s32 %s1203_s15, %s1290_s24 }
  0x11   : > { %s1075_s29 = scalar_lea.hbm %s1708_s1, 4096 }
  0x12   : > { %p1285_p11 = pnand %p940_p9, %p1711_p1  ;;  %p1076_p12 = scmp.ne.s32.totalorder %s1708_s1, %s1075_s29 }
  0x13   : > { %p1082_p5 = scmp.lt.u32.totalorder %s1075_s29, %s1708_s1 }
  0x14   : > { %p1077_p13 = pneg %p1285_p11 }
  0x16   : > { %p1078_p0 = pnand %p1077_p13, %p1076_p12 }
  0x18   : > { %p1079_p3 = pneg %p1078_p0 }
  0x1a   : > { %p1084_p7 = pnand %p1082_p5, %p1079_p3 }
  0x1c   : > { %1087 = shalt.err (!%p1084_p7)
}
  0x1d   : > { %s1088_s7 = scalar_lea.vmem %s1278_s22, 4096  ;;  %p1096_p2 = scmp.lt.s32.totalorder %s1278_s22, %s1278_s22 }
  0x1e   : > { %p1089_p9 = scmp.ne.s32.totalorder %s1278_s22, %s1088_s7  ;;  %p1097_p6 = scmp.lt.s32.totalorder %s1088_s7, %s1088_s7 }
  0x20   : > { %p1091_p10 = pnand %p1089_p9, %p1077_p13  ;;  %p1098_p4 = por %p1097_p6, %p1096_p2 }
  0x22   : > { %p1092_p1 = pneg %p1091_p10 }
  0x24   : > { %p1099_p8 = pnand %p1098_p4, %p1092_p1 }
  0x26   : > { %1102 = shalt.err (!%p1099_p8)
}
  0x27   : > { %s1206_s8 = smov 128   ;;  %s1207_s9 = smov 8  }
  0x28   : > { %943 = dma.hbm_to_vmem [thread:$0]  (!%p1285_p11), %s1708_s1, 4096, %s1278_s22, [#allocation6], %s1206_s8, %s1206_s8, %s1207_s9  }
  0x29   : > { %p25_p2 = scmp.eq.s32.totalorder %s24_s26, 0  ;;  %p34_p1 = scmp.ne.s32.totalorder %s1199_s14, %s1195_s13 }
  0x2a   : > { %p35_p4 = scmp.eq.s32.totalorder %s1203_s15, 0  ;;  %p953_p6 = scmp.lt.s32.totalorder %s1203_s15, 2 }
  0x2b   : > { %s1321_s17 = scalar_select %p25_p2, %s1199_s14, %s27_s25  }
  0x2c   : > { %p36_p8 = por %p35_p4, %p34_p1  ;;  %p1718_p10 = scmp.eq.s32.totalorder %s1255_s16, 1 }
  0x2d   : > { %s148_s27 = sand.u32 1, %s1199_s14   ;;  %s897_s28 = sshll.u32 %s1203_s15, 12 }
  0x2e   : > { %p1325_p12 = por %p1718_p10, %p34_p1  ;;  %s850_s29 = sshll.u32 %s148_s27, 8 }
  0x2f   : > { %s1334_s4 = scalar_lea.hbm %s1707_s0, %s897_s28  ;;  %s152_s22 = scalar_lea.vmem [#allocation2], %s850_s29 }
  0x30   : > { %s160_s25 = sshll.u32 %s152_s22, 4  ;;  %p1336_p11 = pnand %p953_p6, %p36_p8  ;;  %s1340_s25 = int_to_ptr.vmem [resolvable:$true] %s160_s25 }
  0x31   : > { %s1342_s5 = scalar_lea.sflag [#allocation3], %s148_s27  ;;  %s1103_s6 = scalar_lea.hbm %s1334_s4, 4096 }
  0x32   : > { %p1104_p13 = scmp.ne.s32.totalorder %s1334_s4, %s1103_s6  ;;  %p1105_p0 = pneg %p1336_p11 }
  0x33   : > { %s1108_s9 = scalar_lea.hbm %s1707_s0, 8192  ;;  %p1109_p7 = scmp.lt.u32.totalorder %s1334_s4, %s1707_s0 }
  0x34   : > { %p1106_p3 = pnand %p1105_p0, %p1104_p13  ;;  %p1110_p9 = scmp.lt.u32.totalorder %s1108_s9, %s1103_s6 }
  0x35   : > { %p1112_p1 = scmp.lt.u32.totalorder %s1103_s6, %s1334_s4 }
  0x36   : > { %p1107_p5 = pneg %p1106_p3  ;;  %p1111_p2 = por %p1110_p9, %p1109_p7 }
  0x38   : > { %p1113_p4 = por %p1112_p1, %p1111_p2 }
  0x3a   : > { %p1114_p6 = pnand %p1113_p4, %p1107_p5 }
  0x3c   : > { %1117 = shalt.err (!%p1114_p6)
}
  0x3d   : > { %s1118_s27 = scalar_lea.vmem %s1340_s25, 4096  ;;  %s1208_s28 = smov [#allocation2]  }
  0x3e   : > { %p1119_p8 = scmp.ne.s32.totalorder %s1340_s25, %s1118_s27  ;;  %s1123_s29 = sshll.u32 %s1208_s28, 4  ;;  %s1124_s29 = int_to_ptr.vmem [resolvable:$false] %s1123_s29 }
  0x3f   : > { %s1125_s23 = scalar_lea.vmem %s1124_s29, 8192  ;;  %p1126_p3 = scmp.lt.s32.totalorder %s1340_s25, %s1124_s29 }
  0x40   : > { %p1121_p10 = pnand %p1119_p8, %p1105_p0  ;;  %p1127_p7 = scmp.lt.s32.totalorder %s1125_s23, %s1118_s27 }
  0x42   : > { %p1122_p13 = pneg %p1121_p10  ;;  %p1128_p9 = por %p1127_p7, %p1126_p3 }
  0x44   : > { %p1129_p2 = pnand %p1128_p9, %p1122_p13 }
  0x46   : > { %1132 = shalt.err (!%p1129_p2)
}
  0x47   : > { %s1209_s30 = smov 256   ;;  %s1210_s22 = smov 16  }
  0x48   : > { %947 = dma.hbm_to_vmem [thread:$0]  (!%p1336_p11), %s1334_s4, 4096, %s1340_s25, %s1342_s5, %s1209_s30, %s1209_s30, %s1210_s22  }
  0x49   : > { %p1721_p0 = scmp.ne.s32.totalorder %s1716_s20, 0 }
  0x4a   : > { %s1373_s6 = sand.u32 (!%p1721_p0), 1, %s1195_s13   ;;  %p1722_p5 = scmp.ne.s32.totalorder (!%p1721_p0), %s1714_s18, 0 }
  0x4b   : > { %172 = sbr.rel (%p1721_p0) target bundleno = 574 (0x23e), region = 32  ;;  %s855_s7 = sshll.u32 (!%p1721_p0), %s1373_s6, 8 }
  0x4c   : > { %s175_s8 = scalar_lea.sflag (!%p1721_p0), [#allocation3], %s1373_s6  ;;  %s1379_s9 = scalar_lea.vmem (!%p1721_p0), [#allocation2], %s855_s7 }
  0x52   : > { %1178 = dma.done.wait (%p1722_p5), %s175_s8, 4096  }
  0x53   : > { %1180 = vsyncadd (%p1722_p5), %s175_s8, 4294963200  ;;  %p1723_p11 = scmp.eq.s32.totalorder %s1255_s16, 0 }
  0x55   : > { %1182 = dma.done.wait (%p1723_p11), [#allocation6], 4096   ;;  %p1724_p1 = pmov %p1723_p11 }
  0x56   : > { %v995_v0 = vld [vmem:[#allocation5 + $0x4] ss:$8 sps:$4 sm:$0xff]   ;;  %v997_v1 = vld [vmem:[#allocation5] ss:$8 sps:$4 sm:$0xff]   ;;  %v998_v2 = vld [vmem:[#allocation5 + $0x14] ss:$8 sps:$4 sm:$0xff]  }
  0x57   : > { %1184 = vsyncadd (%p1724_p1), [#allocation6], 4294963200  ;;  %459 = vmatprep.subr.bf16.mxu0 %v995_v0  ;;  %900 = vmatprep.subr.bf16.mxu1 %v995_v0  ;;  %v1000_v3 = vld [vmem:[#allocation5 + $0x10] ss:$8 sps:$4 sm:$0xff]   ;;  %v1001_v4 = vld [vmem:[#allocation5 + $0x24] ss:$8 sps:$4 sm:$0xff]  }
  0x58   : > { %460 = vmatpush1.bf16.msra.mxu0 %v997_v1  ;;  %916 = vmatpush1.bf16.msra.mxu1 %v997_v1  ;;  %v1003_v5 = vld [vmem:[#allocation5 + $0x20] ss:$8 sps:$4 sm:$0xff]   ;;  %v1004_v6 = vld [vmem:[#allocation5 + $0x34] ss:$8 sps:$4 sm:$0xff]   ;;  %v1006_v7 = vld [vmem:[#allocation5 + $0x30] ss:$8 sps:$4 sm:$0xff]  }
  0x59   : > { %461 = vmatprep.subr.bf16.mxu0 %v998_v2  ;;  %901 = vmatprep.subr.bf16.mxu1 %v998_v2  ;;  %v1007_v8 = vld [vmem:[#allocation5 + $0x44] ss:$8 sps:$4 sm:$0xff]   ;;  %v1009_v9 = vld [vmem:[#allocation5 + $0x40] ss:$8 sps:$4 sm:$0xff]   ;;  %v1010_v10 = vld [vmem:[#allocation5 + $0x54] ss:$8 sps:$4 sm:$0xff]  }
  0x5a   : > { %v1012_v11 = vld [vmem:[#allocation5 + $0x50] ss:$8 sps:$4 sm:$0xff]   ;;  %v1013_v12 = vld [vmem:[#allocation5 + $0x64] ss:$8 sps:$4 sm:$0xff]   ;;  %v1015_v18 = vld [vmem:[#allocation5 + $0x60] ss:$8 sps:$4 sm:$0xff]  }
  0x5b   : > { %v208_v13 = vld [vmem:[%s1379_s9 + $0x8] sm:$0xff]  ;;  %v210_v14 = vld [vmem:[%s1379_s9 + $0x18] sm:$0xff]  ;;  %v207_v38 = vld [vmem:[%s1379_s9] sm:$0xff]  ;;  %s1592_s4 = scalar_lea.vmem [#allocation7], %s855_s7  ;;  %s899_s25 = sshll.u32 %s1255_s16, 12 }
  0x5c   : > { %462 = vmatpush1.bf16.msra.mxu0 %v1000_v3  ;;  %917 = vmatpush1.bf16.msra.mxu1 %v1000_v3  ;;  %v240_v15 = vpack.c.bf16 %v210_v14, %v208_v13  ;;  %v224_v16 = vld [vmem:[%s1379_s9 + $0x88] sm:$0xff]  ;;  %v226_v17 = vld [vmem:[%s1379_s9 + $0x98] sm:$0xff]  ;;  %v209_v39 = vld [vmem:[%s1379_s9 + $0x10] sm:$0xff]  ;;  %s763_s26 = sshll.u32 %s1592_s4, 4  ;;  %s1657_s11 = scalar_lea.hbm %s1710_s3, %s899_s25  ;;  %s1659_s26 = int_to_ptr.vmem [resolvable:$true] %s763_s26 }
  0x5d   : > { %463 = vmatprep.subr.bf16.mxu0 %v1001_v4  ;;  %902 = vmatprep.subr.bf16.mxu1 %v1001_v4  ;;  %v248_v19 = vpack.c.bf16 %v226_v17, %v224_v16  ;;  %v1016_v20 = vld [vmem:[#allocation5 + $0x74] ss:$8 sps:$4 sm:$0xff]   ;;  %v1018_v21 = vld [vmem:[#allocation5 + $0x70] ss:$8 sps:$4 sm:$0xff]   ;;  %v1019_v22 = vld [vmem:[#allocation5 + $0x84] ss:$8 sps:$4 sm:$0xff]   ;;  %v239_v46 = vpack.c.bf16 %v209_v39, %v207_v38  ;;  %v289_v16 = vlaneseq }
  0x5e   : > { %491 = vmatprep.mubr.bf16.mxu0 %v240_v15  ;;  %v1021_v23 = vld [vmem:[#allocation5 + $0x80] ss:$8 sps:$4 sm:$0xff]   ;;  %v1022_v24 = vld [vmem:[#allocation5 + $0x94] ss:$8 sps:$4 sm:$0xff]   ;;  %v1024_v25 = vld [vmem:[#allocation5 + $0x90] ss:$8 sps:$4 sm:$0xff]  }
  0x5f   : > { %531 = vmatprep.mubr.bf16.mxu1 %v248_v19  ;;  %v1025_v26 = vld [vmem:[#allocation5 + $0xa4] ss:$8 sps:$4 sm:$0xff]   ;;  %v1027_v27 = vld [vmem:[#allocation5 + $0xa0] ss:$8 sps:$4 sm:$0xff]   ;;  %v1028_v28 = vld [vmem:[#allocation5 + $0xb4] ss:$8 sps:$4 sm:$0xff]  }
  0x60   : > { %464 = vmatpush1.bf16.msra.mxu0 %v1003_v5  ;;  %918 = vmatpush1.bf16.msra.mxu1 %v1003_v5  ;;  %v1030_v29 = vld [vmem:[#allocation5 + $0xb0] ss:$8 sps:$4 sm:$0xff]   ;;  %v1031_v30 = vld [vmem:[#allocation5 + $0xc4] ss:$8 sps:$4 sm:$0xff]   ;;  %v1033_v31 = vld [vmem:[#allocation5 + $0xc0] ss:$8 sps:$4 sm:$0xff]  }
  0x61   : > { %465 = vmatprep.subr.bf16.mxu0 %v1004_v6  ;;  %903 = vmatprep.subr.bf16.mxu1 %v1004_v6  ;;  %v1034_v32 = vld [vmem:[#allocation5 + $0xd4] ss:$8 sps:$4 sm:$0xff]   ;;  %v1036_v33 = vld [vmem:[#allocation5 + $0xd0] ss:$8 sps:$4 sm:$0xff]   ;;  %v1037_v34 = vld [vmem:[#allocation5 + $0xe4] ss:$8 sps:$4 sm:$0xff]  }
  0x62   : > { %v1039_v35 = vld [vmem:[#allocation5 + $0xe0] ss:$8 sps:$4 sm:$0xff]   ;;  %v1040_v36 = vld [vmem:[#allocation5 + $0xf4] ss:$8 sps:$4 sm:$0xff]   ;;  %v1042_v37 = vld [vmem:[#allocation5 + $0xf0] ss:$8 sps:$4 sm:$0xff]  }
  0x63   : > { %v223_v40 = vld [vmem:[%s1379_s9 + $0x80] sm:$0xff]  ;;  %v225_v41 = vld [vmem:[%s1379_s9 + $0x90] sm:$0xff]  ;;  %v212_v42 = vld [vmem:[%s1379_s9 + $0x28] sm:$0xff]  ;;  %v290_v17 = vshrl.u32 %v289_v16, 7  ;;  %s749_s16 = scalar_lea.sflag [#allocation4], %s1373_s6  ;;  %s1133_s27 = scalar_lea.vmem %s1659_s26, 4096 }
  0x64   : > { %466 = vmatpush1.bf16.msra.mxu0 %v1006_v7  ;;  %919 = vmatpush1.bf16.msra.mxu1 %v1006_v7  ;;  %v214_v43 = vld [vmem:[%s1379_s9 + $0x38] sm:$0xff]  ;;  %v228_v44 = vld [vmem:[%s1379_s9 + $0xa8] sm:$0xff]  ;;  %v247_v47 = vpack.c.bf16 %v225_v41, %v223_v40  ;;  %v211_v50 = vld [vmem:[%s1379_s9 + $0x20] sm:$0xff]  ;;  %p1134_p4 = scmp.ne.s32.totalorder %s1659_s26, %s1133_s27  ;;  %s1211_s28 = smov [#allocation7]  }
  0x65   : > { %467 = vmatprep.subr.bf16.mxu0 %v1007_v8  ;;  %904 = vmatprep.subr.bf16.mxu1 %v1007_v8  ;;  %v230_v45 = vld [vmem:[%s1379_s9 + $0xb8] sm:$0xff]  ;;  %v242_v48 = vpack.c.bf16 %v214_v43, %v212_v42  ;;  %v213_v51 = vld [vmem:[%s1379_s9 + $0x30] sm:$0xff]  ;;  %v227_v52 = vld [vmem:[%s1379_s9 + $0xa0] sm:$0xff]  ;;  %s1137_s29 = sshll.u32 %s1211_s28, 4  ;;  %s1138_s29 = int_to_ptr.vmem [resolvable:$false] %s1137_s29 }
  0x66   : > { %v250_v49 = vpack.c.bf16 %v230_v45, %v228_v44  ;;  %v229_v53 = vld [vmem:[%s1379_s9 + $0xb0] sm:$0xff]  ;;  %v216_v54 = vld [vmem:[%s1379_s9 + $0x48] sm:$0xff]  ;;  %v218_v55 = vld [vmem:[%s1379_s9 + $0x58] sm:$0xff]  ;;  %v241_v58 = vpack.c.bf16 %v213_v51, %v211_v50  ;;  %p1135_p6 = pnand %p1134_p4, %p1325_p12  ;;  %s1139_s23 = scalar_lea.vmem %s1138_s29, 8192 }
  0x67   : > { %v232_v56 = vld [vmem:[%s1379_s9 + $0xc8] sm:$0xff]  ;;  %v234_v57 = vld [vmem:[%s1379_s9 + $0xd8] sm:$0xff]  ;;  %v249_v59 = vpack.c.bf16 %v229_v53, %v227_v52  ;;  %v244_v60 = vpack.c.bf16 %v218_v55, %v216_v54  ;;  %v215_v62 = vld [vmem:[%s1379_s9 + $0x40] sm:$0xff]  ;;  %p1140_p10 = scmp.lt.s32.totalorder %s1659_s26, %s1138_s29  ;;  %p1141_p13 = scmp.lt.s32.totalorder %s1139_s23, %s1133_s27 }
  0x68   : > { %468 = vmatpush1.bf16.msra.mxu0 %v1009_v9  ;;  %920 = vmatpush1.bf16.msra.mxu1 %v1009_v9  ;;  %v252_v61 = vpack.c.bf16 %v234_v57, %v232_v56  ;;  %v217_v63 = vld [vmem:[%s1379_s9 + $0x50] sm:$0xff]  ;;  %v231_v0 = vld [vmem:[%s1379_s9 + $0xc0] sm:$0xff]  ;;  %v220_v2 = vld [vmem:[%s1379_s9 + $0x68] sm:$0xff]  ;;  %p1136_p8 = pneg %p1135_p6 }
  0x69   : > { %469 = vmatprep.subr.bf16.mxu0 %v1010_v10  ;;  %905 = vmatprep.subr.bf16.mxu1 %v1010_v10  ;;  %v233_v1 = vld [vmem:[%s1379_s9 + $0xd0] sm:$0xff]  ;;  %v222_v3 = vld [vmem:[%s1379_s9 + $0x78] sm:$0xff]  ;;  %v236_v4 = vld [vmem:[%s1379_s9 + $0xe8] sm:$0xff]  ;;  %v243_v6 = vpack.c.bf16 %v217_v63, %v215_v62  ;;  %p1142_p3 = por %p1141_p13, %p1140_p10 }
  0x6a   : > { %v238_v5 = vld [vmem:[%s1379_s9 + $0xf8] sm:$0xff]  ;;  %v251_v7 = vpack.c.bf16 %v233_v1, %v231_v0  ;;  %v246_v8 = vpack.c.bf16 %v222_v3, %v220_v2  ;;  %v219_v10 = vld [vmem:[%s1379_s9 + $0x60] sm:$0xff]  ;;  %v237_v13 = vld [vmem:[%s1379_s9 + $0xf0] sm:$0xff] }
  0x6b   : > { %v254_v9 = vpack.c.bf16 %v238_v5, %v236_v4  ;;  %v287_v19 = vld [vmem:[%s1709_s2] sm:$0x3]  ;;  %p1143_p7 = pnand %p1142_p3, %p1136_p8 }
  0x6c   : > { %470 = vmatpush1.bf16.msra.mxu0 %v1012_v11  ;;  %921 = vmatpush1.bf16.msra.mxu1 %v1012_v11  ;;  %v221_v11 = vld [vmem:[%s1379_s9 + $0x70] sm:$0xff] }
  0x6d   : > { %471 = vmatprep.subr.bf16.mxu0 %v1013_v12  ;;  %906 = vmatprep.subr.bf16.mxu1 %v1013_v12  ;;  %v235_v12 = vld [vmem:[%s1379_s9 + $0xe0] sm:$0xff]  ;;  %v245_v14 = vpack.c.bf16 %v221_v11, %v219_v10 }
  0x6e   : > { %v253_v15 = vpack.c.bf16 %v237_v13, %v235_v12 }
  0x70   : > { %472 = vmatpush1.bf16.msra.mxu0 %v1015_v18  ;;  %922 = vmatpush1.bf16.msra.mxu1 %v1015_v18  ;;  %v291_v18 = vsub.s32 0, %v290_v17 }
  0x71   : > { %473 = vmatprep.subr.bf16.mxu0 %v1016_v20  ;;  %907 = vmatprep.subr.bf16.mxu1 %v1016_v20  ;;  %v295_v20 = vsub.s32 1, %v290_v17 }
  0x74   : > { %474 = vmatpush1.bf16.msra.mxu0 %v1018_v21  ;;  %923 = vmatpush1.bf16.msra.mxu1 %v1018_v21  ;;  %v1424_v21 = vrot.slane %v287_v19, %v291_v18 }
  0x75   : > { %475 = vmatprep.subr.bf16.mxu0 %v1019_v22  ;;  %908 = vmatprep.subr.bf16.mxu1 %v1019_v22  ;;  %v1426_v22 = vrot.slane %v287_v19, %v295_v20 }
  0x78   : > { %476 = vmatpush1.bf16.msra.mxu0 %v1021_v23  ;;  %924 = vmatpush1.bf16.msra.mxu1 %v1021_v23 }
  0x79   : > { %477 = vmatprep.subr.bf16.mxu0 %v1022_v24  ;;  %909 = vmatprep.subr.bf16.mxu1 %v1022_v24 }
  0x7c   : > { %478 = vmatpush1.bf16.msra.mxu0 %v1024_v25  ;;  %925 = vmatpush1.bf16.msra.mxu1 %v1024_v25 }
  0x7d   : > { %479 = vmatprep.subr.bf16.mxu0 %v1025_v26  ;;  %910 = vmatprep.subr.bf16.mxu1 %v1025_v26 }
  0x80   : > { %480 = vmatpush1.bf16.msra.mxu0 %v1027_v27  ;;  %926 = vmatpush1.bf16.msra.mxu1 %v1027_v27 }
  0x81   : > { %481 = vmatprep.subr.bf16.mxu0 %v1028_v28  ;;  %911 = vmatprep.subr.bf16.mxu1 %v1028_v28 }
  0x84   : > { %482 = vmatpush1.bf16.msra.mxu0 %v1030_v29  ;;  %927 = vmatpush1.bf16.msra.mxu1 %v1030_v29 }
  0x85   : > { %483 = vmatprep.subr.bf16.mxu0 %v1031_v30  ;;  %912 = vmatprep.subr.bf16.mxu1 %v1031_v30 }
  0x88   : > { %484 = vmatpush1.bf16.msra.mxu0 %v1033_v31  ;;  %928 = vmatpush1.bf16.msra.mxu1 %v1033_v31 }
  0x89   : > { %485 = vmatprep.subr.bf16.mxu0 %v1034_v32  ;;  %913 = vmatprep.subr.bf16.mxu1 %v1034_v32 }
  0x8c   : > { %486 = vmatpush1.bf16.msra.mxu0 %v1036_v33  ;;  %929 = vmatpush1.bf16.msra.mxu1 %v1036_v33 }
  0x8d   : > { %487 = vmatprep.subr.bf16.mxu0 %v1037_v34  ;;  %914 = vmatprep.subr.bf16.mxu1 %v1037_v34 }
  0x90   : > { %488 = vmatpush1.bf16.msra.mxu0 %v1039_v35  ;;  %930 = vmatpush1.bf16.msra.mxu1 %v1039_v35 }
  0x91   : > { %489 = vmatprep.subr.bf16.mxu0 %v1040_v36  ;;  %915 = vmatprep.subr.bf16.mxu1 %v1040_v36 }
  0x94   : > { %490 = vmatpush1.bf16.msra.mxu0 %v1042_v37  ;;  %931 = vmatpush1.bf16.msra.mxu1 %v1042_v37 }
  0x97   : > { %492 = vmatmul.mubr.bf16.vlgmr.msra.gmra.mrb[0].mxu0 %v239_v46  ;;  %532 = vmatmul.mubr.bf16.vlgmr.msra.gmra.mrb[0].mxu1 %v247_v47 }
  0x98   : > { %501 = vmatprep.mubr.bf16.mxu0 %v242_v48  ;;  %541 = vmatprep.mubr.bf16.mxu1 %v250_v49 }
  0x9f   : > { %502 = vmatmul.mubr.bf16.gmra.mrb[4].mxu0 %v241_v58  ;;  %542 = vmatmul.mubr.bf16.gmra.mrb[4].mxu1 %v249_v59 }
  0xa0   : > { %511 = vmatprep.mubr.bf16.mxu0 %v244_v60  ;;  %551 = vmatprep.mubr.bf16.mxu1 %v252_v61 }
  0xa7   : > { %512 = vmatmul.mubr.bf16.gmra.mrb[8].mxu0 %v243_v6  ;;  %552 = vmatmul.mubr.bf16.gmra.mrb[8].mxu1 %v251_v7 }
  0xa8   : > { %521 = vmatprep.mubr.bf16.mxu0 %v246_v8  ;;  %561 = vmatprep.mubr.bf16.mxu1 %v254_v9 }
  0xaf   : > { %522 = vmatmul.mubr.bf16.gmra.mrb[12].mxu0 %v245_v14  ;;  %562 = vmatmul.mubr.bf16.gmra.mrb[12].mxu1 %v253_v15 }
 0x16a   : > { %v493_v23 = vpop.f32.mrb[0].mxu0  ;;  %v533_v24 = vpop.f32.mrb[0].mxu1 }
 0x16b   : > { %v1429_v25 = vadd.f32 %v493_v23, %v1424_v21  ;;  %v495_v26 = vpop.f32.mrb[1].mxu0  ;;  %v535_v27 = vpop.f32.mrb[1].mxu1  ;;  %v1432_v28 = vadd.f32 %v533_v24, %v1424_v21 }
 0x16c   : > { %v1435_v29 = vadd.f32 %v495_v26, %v1426_v22  ;;  %v1438_v30 = vadd.f32 %v535_v27, %v1426_v22  ;;  %v497_v31 = vpop.f32.mrb[2].mxu0  ;;  %v537_v32 = vpop.f32.mrb[2].mxu1 }
 0x16d   : > { %v1441_v33 = vadd.f32 %v537_v32, %v1424_v21  ;;  %v499_v34 = vpop.f32.mrb[3].mxu0  ;;  %v539_v35 = vpop.f32.mrb[3].mxu1  ;;  %v572_v36 = vmul.f32 %v1429_v25, %v1429_v25  ;;  %v1451_v39 = vadd.f32 %v497_v31, %v1424_v21  ;;  %v588_v42 = vmul.f32 %v1432_v28, %v1432_v28 }
 0x16e   : > { %v1446_v37 = vadd.f32 %v539_v35, %v1426_v22  ;;  %v573_v38 = vmul.f32 %v1435_v29, %v1435_v29  ;;  %v1454_v40 = vadd.f32 %v499_v34, %v1426_v22  ;;  %v589_v43 = vmul.f32 %v1438_v30, %v1438_v30 }
 0x16f   : > { %v590_v41 = vmul.f32 %v1441_v33, %v1441_v33  ;;  %v574_v49 = vmul.f32 %v1451_v39, %v1451_v39 }
 0x170   : > { %v604_v44 = vadd.f32 %v573_v38, %v572_v36  ;;  %v591_v45 = vmul.f32 %v1446_v37, %v1446_v37  ;;  %v575_v50 = vmul.f32 %v1454_v40, %v1454_v40  ;;  %v628_v58 = vadd.f32 %v589_v43, %v588_v42 }
 0x172   : > { %v503_v46 = vpop.f32.mrb[4].mxu0  ;;  %605 = vadd.xlane.f32.xlu0 %v604_v44  ;;  %v631_v47 = vadd.f32 %v591_v45, %v590_v41  ;;  %v543_v48 = vpop.f32.mrb[4].mxu1  ;;  %v607_v5 = vadd.f32 %v575_v50, %v574_v49 }
 0x173   : > { %v1469_v51 = vadd.f32 %v503_v46, %v1424_v21  ;;  %v505_v52 = vpop.f32.mrb[5].mxu0  ;;  %v1472_v53 = vadd.f32 %v543_v48, %v1424_v21  ;;  %v545_v54 = vpop.f32.mrb[5].mxu1 }
 0x174   : > { %v1475_v55 = vadd.f32 %v505_v52, %v1426_v22  ;;  %632 = vadd.xlane.f32.xlu1 %v631_v47  ;;  %v507_v56 = vpop.f32.mrb[6].mxu0  ;;  %v1478_v57 = vadd.f32 %v545_v54, %v1426_v22  ;;  %v547_v59 = vpop.f32.mrb[6].mxu1 }
 0x175   : > { %v576_v60 = vmul.f32 %v1469_v51, %v1469_v51  ;;  %v1483_v61 = vadd.f32 %v507_v56, %v1424_v21  ;;  %v509_v62 = vpop.f32.mrb[7].mxu0  ;;  %v549_v63 = vpop.f32.mrb[7].mxu1  ;;  %v592_v2 = vmul.f32 %v1472_v53, %v1472_v53  ;;  %v1495_v4 = vadd.f32 %v547_v59, %v1424_v21 }
 0x176   : > { %v577_v0 = vmul.f32 %v1475_v55, %v1475_v55  ;;  %v1488_v1 = vadd.f32 %v509_v62, %v1426_v22  ;;  %v593_v3 = vmul.f32 %v1478_v57, %v1478_v57  ;;  %629 = vadd.xlane.f32.xlu0 %v628_v58  ;;  %v1502_v8 = vadd.f32 %v549_v63, %v1426_v22 }
 0x177   : > { %v578_v6 = vmul.f32 %v1483_v61, %v1483_v61  ;;  %v594_v13 = vmul.f32 %v1495_v4, %v1495_v4 }
 0x178   : > { %v579_v7 = vmul.f32 %v1488_v1, %v1488_v1  ;;  %v610_v9 = vadd.f32 %v577_v0, %v576_v60  ;;  %v634_v12 = vadd.f32 %v593_v3, %v592_v2  ;;  %v595_v18 = vmul.f32 %v1502_v8, %v1502_v8 }
 0x17a   : > { %v513_v10 = vpop.f32.mrb[8].mxu0  ;;  %611 = vadd.xlane.f32.xlu1 %v610_v9  ;;  %608 = vadd.xlane.f32.xlu0 %v607_v5  ;;  %v553_v11 = vpop.f32.mrb[8].mxu1  ;;  %v613_v24 = vadd.f32 %v579_v7, %v578_v6  ;;  %v637_v46 = vadd.f32 %v595_v18, %v594_v13 }
 0x17b   : > { %v1507_v14 = vadd.f32 %v513_v10, %v1424_v21  ;;  %v515_v15 = vpop.f32.mrb[9].mxu0  ;;  %v1510_v16 = vadd.f32 %v553_v11, %v1424_v21  ;;  %v555_v17 = vpop.f32.mrb[9].mxu1 }
 0x17c   : > { %v1515_v19 = vadd.f32 %v515_v15, %v1426_v22  ;;  %v517_v20 = vpop.f32.mrb[10].mxu0  ;;  %v1518_v23 = vadd.f32 %v555_v17, %v1426_v22  ;;  %v557_v26 = vpop.f32.mrb[10].mxu1 }
 0x17d   : > { %v580_v27 = vmul.f32 %v1507_v14, %v1507_v14  ;;  %v1523_v31 = vadd.f32 %v517_v20, %v1424_v21  ;;  %v519_v32 = vpop.f32.mrb[11].mxu0  ;;  %v596_v34 = vmul.f32 %v1510_v16, %v1510_v16  ;;  %v559_v35 = vpop.f32.mrb[11].mxu1  ;;  %v1535_v42 = vadd.f32 %v557_v26, %v1424_v21 }
 0x17e   : > { %v581_v36 = vmul.f32 %v1515_v19, %v1515_v19  ;;  %v1530_v38 = vadd.f32 %v519_v32, %v1426_v22  ;;  %v597_v41 = vmul.f32 %v1518_v23, %v1518_v23  ;;  %614 = vadd.xlane.f32.xlu1 %v613_v24  ;;  %635 = vadd.xlane.f32.xlu0 %v634_v12 }
 0x17f   : > { %v1538_v43 = vadd.f32 %v559_v35, %v1426_v22  ;;  %v582_v44 = vmul.f32 %v1523_v31, %v1523_v31  ;;  %v598_v52 = vmul.f32 %v1535_v42, %v1535_v42 }
 0x180   : > { %v583_v45 = vmul.f32 %v1530_v38, %v1530_v38  ;;  %v616_v47 = vadd.f32 %v581_v36, %v580_v27  ;;  %v640_v50 = vadd.f32 %v597_v41, %v596_v34 }
 0x181   : > { %v599_v54 = vmul.f32 %v1538_v43, %v1538_v43 }
 0x182   : > { %v523_v48 = vpop.f32.mrb[12].mxu0  ;;  %638 = vadd.xlane.f32.xlu1 %v637_v46  ;;  %617 = vadd.xlane.f32.xlu0 %v616_v47  ;;  %v563_v49 = vpop.f32.mrb[12].mxu1  ;;  %v619_v2 = vadd.f32 %v583_v45, %v582_v44 }
 0x183   : > { %v1549_v56 = vadd.f32 %v523_v48, %v1424_v21  ;;  %v525_v58 = vpop.f32.mrb[13].mxu0  ;;  %v1552_v59 = vadd.f32 %v563_v49, %v1424_v21  ;;  %v565_v60 = vpop.f32.mrb[13].mxu1  ;;  %v643_v17 = vadd.f32 %v599_v54, %v598_v52 }
 0x184   : > { %v1555_v62 = vadd.f32 %v525_v58, %v1426_v22  ;;  %v527_v63 = vpop.f32.mrb[14].mxu0  ;;  %v1558_v0 = vadd.f32 %v565_v60, %v1426_v22  ;;  %v567_v3 = vpop.f32.mrb[14].mxu1 }
 0x185   : > { %v584_v5 = vmul.f32 %v1549_v56, %v1549_v56  ;;  %v1563_v6 = vadd.f32 %v527_v63, %v1424_v21  ;;  %v529_v7 = vpop.f32.mrb[15].mxu0  ;;  %v600_v9 = vmul.f32 %v1552_v59, %v1552_v59  ;;  %v569_v10 = vpop.f32.mrb[15].mxu1  ;;  %v1575_v15 = vadd.f32 %v567_v3, %v1424_v21 }
 0x186   : > { %v585_v11 = vmul.f32 %v1555_v62, %v1555_v62  ;;  %v1570_v12 = vadd.f32 %v529_v7, %v1426_v22  ;;  %v601_v13 = vmul.f32 %v1558_v0, %v1558_v0  ;;  %620 = vadd.xlane.f32.xlu1 %v619_v2  ;;  %641 = vadd.xlane.f32.xlu0 %v640_v50 }
 0x187   : > { %v586_v18 = vmul.f32 %v1563_v6, %v1563_v6  ;;  %v1582_v24 = vadd.f32 %v569_v10, %v1426_v22  ;;  %v602_v32 = vmul.f32 %v1575_v15, %v1575_v15 }
 0x188   : > { %v587_v20 = vmul.f32 %v1570_v12, %v1570_v12  ;;  %v622_v26 = vadd.f32 %v585_v11, %v584_v5  ;;  %v646_v27 = vadd.f32 %v601_v13, %v600_v9 }
 0x189   : > { %v603_v21 = vmul.f32 %v1582_v24, %v1582_v24 }
 0x18a   : > { %644 = vadd.xlane.f32.xlu1 %v643_v17  ;;  %623 = vadd.xlane.f32.xlu0 %v622_v26  ;;  %v625_v34 = vadd.f32 %v587_v20, %v586_v18 }
 0x18b   : > { %v649_v35 = vadd.f32 %v603_v21, %v602_v32 }
 0x18e   : > { %626 = vadd.xlane.f32.xlu1 %v625_v34  ;;  %647 = vadd.xlane.f32.xlu0 %v646_v27 }
 0x192   : > { %650 = vadd.xlane.f32.xlu1 %v649_v35 }
 0x1ff   : > { %v606_v36 = vpop.xlane.xlu0 %605 }
 0x200   : > { %v652_v41 = vmax.f32 %v606_v36, 1e-24 }
 0x201   : > { %v633_v44 = vpop.xlane.xlu1 %632 }
 0x202   : > { %1043 = vrsqrt.f32 %v652_v41  ;;  %v661_v22 = vmax.f32 %v633_v44, 1e-24 }
 0x203   : > { %v630_v45 = vpop.xlane.xlu0 %629 }
 0x204   : > { %1045 = vrsqrt.f32 %v661_v22  ;;  %v660_v46 = vmax.f32 %v630_v45, 1e-24 }
 0x206   : > { %1047 = vrsqrt.f32 %v660_v46 }
 0x207   : > { %v612_v47 = vpop.xlane.xlu1 %611  ;;  %v609_v48 = vpop.xlane.xlu0 %608 }
 0x208   : > { %v654_v49 = vmax.f32 %v612_v47, 1e-24  ;;  %v653_v50 = vmax.f32 %v609_v48, 1e-24 }
 0x20a   : > { %1049 = vrsqrt.f32 %v654_v49 }
 0x20b   : > { %1051 = vrsqrt.f32 %v653_v50  ;;  %v615_v52 = vpop.xlane.xlu1 %614  ;;  %v636_v54 = vpop.xlane.xlu0 %635 }
 0x20c   : > { %v1044_v58 = vpop.eup %1043  ;;  %v655_v60 = vmax.f32 %v615_v52, 1e-24  ;;  %v662_v63 = vmax.f32 %v636_v54, 1e-24 }
 0x20d   : > { %v684_v2 = vmul.f32 %v1044_v58, %v1429_v25  ;;  %v685_v3 = vmul.f32 %v1044_v58, %v1435_v29 }
 0x20e   : > { %v1046_v5 = vpop.eup %1045  ;;  %1053 = vrsqrt.f32 %v655_v60 }
 0x20f   : > { %716 = vst [vmem:[%s1592_s4] sm:$0xff] %v684_v2  ;;  %717 = vst [vmem:[%s1592_s4 + $0x8] sm:$0xff] %v685_v3  ;;  %v702_v7 = vmul.f32 %v1046_v5, %v1441_v33  ;;  %v703_v9 = vmul.f32 %v1046_v5, %v1446_v37  ;;  %1055 = vrsqrt.f32 %v662_v63  ;;  %v639_v25 = vpop.xlane.xlu1 %638  ;;  %v618_v29 = vpop.xlane.xlu0 %617 }
 0x210   : > { %v1048_v10 = vpop.eup %1047  ;;  %v663_v11 = vmax.f32 %v639_v25, 1e-24  ;;  %v656_v13 = vmax.f32 %v618_v29, 1e-24 }
 0x211   : > { %734 = vst [vmem:[%s1592_s4 + $0x90] sm:$0xff] %v702_v7  ;;  %735 = vst [vmem:[%s1592_s4 + $0x98] sm:$0xff] %v703_v9  ;;  %v700_v17 = vmul.f32 %v1048_v10, %v1432_v28  ;;  %v701_v18 = vmul.f32 %v1048_v10, %v1438_v30 }
 0x212   : > { %1057 = vrsqrt.f32 %v663_v11 }
 0x213   : > { %732 = vst [vmem:[%s1592_s4 + $0x80] sm:$0xff] %v700_v17  ;;  %733 = vst [vmem:[%s1592_s4 + $0x88] sm:$0xff] %v701_v18  ;;  %1059 = vrsqrt.f32 %v656_v13  ;;  %v621_v33 = vpop.xlane.xlu1 %620  ;;  %v642_v37 = vpop.xlane.xlu0 %641 }
 0x214   : > { %v1050_v20 = vpop.eup %1049  ;;  %v657_v26 = vmax.f32 %v621_v33, 1e-24  ;;  %v664_v27 = vmax.f32 %v642_v37, 1e-24 }
 0x215   : > { %v1052_v32 = vpop.eup %1051  ;;  %v688_v21 = vmul.f32 %v1050_v20, %v1469_v51  ;;  %v689_v28 = vmul.f32 %v1050_v20, %v1475_v55 }
 0x216   : > { %v686_v30 = vmul.f32 %v1052_v32, %v1451_v39  ;;  %v687_v34 = vmul.f32 %v1052_v32, %v1454_v40  ;;  %1061 = vrsqrt.f32 %v657_v26 }
 0x217   : > { %720 = vst [vmem:[%s1592_s4 + $0x20] sm:$0xff] %v688_v21  ;;  %721 = vst [vmem:[%s1592_s4 + $0x28] sm:$0xff] %v689_v28  ;;  %1063 = vrsqrt.f32 %v664_v27  ;;  %v645_v35 = vpop.xlane.xlu1 %644  ;;  %v624_v36 = vpop.xlane.xlu0 %623 }
 0x218   : > { %v1054_v41 = vpop.eup %1053  ;;  %718 = vst [vmem:[%s1592_s4 + $0x10] sm:$0xff] %v686_v30  ;;  %719 = vst [vmem:[%s1592_s4 + $0x18] sm:$0xff] %v687_v34  ;;  %v665_v51 = vmax.f32 %v645_v35, 1e-24  ;;  %v658_v44 = vmax.f32 %v624_v36, 1e-24 }
 0x219   : > { %v1056_v55 = vpop.eup %1055  ;;  %v690_v39 = vmul.f32 %v1054_v41, %v1483_v61  ;;  %v691_v40 = vmul.f32 %v1054_v41, %v1488_v1 }
 0x21a   : > { %v704_v22 = vmul.f32 %v1056_v55, %v1472_v53  ;;  %v705_v45 = vmul.f32 %v1056_v55, %v1478_v57  ;;  %1065 = vrsqrt.f32 %v665_v51 }
 0x21b   : > { %722 = vst [vmem:[%s1592_s4 + $0x30] sm:$0xff] %v690_v39  ;;  %723 = vst [vmem:[%s1592_s4 + $0x38] sm:$0xff] %v691_v40  ;;  %1067 = vrsqrt.f32 %v658_v44  ;;  %v627_v46 = vpop.xlane.xlu1 %626  ;;  %v648_v47 = vpop.xlane.xlu0 %647 }
 0x21c   : > { %v1058_v48 = vpop.eup %1057  ;;  %736 = vst [vmem:[%s1592_s4 + $0xa0] sm:$0xff] %v704_v22  ;;  %737 = vst [vmem:[%s1592_s4 + $0xa8] sm:$0xff] %v705_v45  ;;  %v659_v61 = vmax.f32 %v627_v46, 1e-24  ;;  %v666_v49 = vmax.f32 %v648_v47, 1e-24 }
 0x21d   : > { %v1060_v1 = vpop.eup %1059  ;;  %v706_v53 = vmul.f32 %v1058_v48, %v1495_v4  ;;  %v707_v57 = vmul.f32 %v1058_v48, %v1502_v8 }
 0x21e   : > { %v692_v50 = vmul.f32 %v1060_v1, %v1507_v14  ;;  %v693_v52 = vmul.f32 %v1060_v1, %v1515_v19  ;;  %1069 = vrsqrt.f32 %v659_v61 }
 0x21f   : > { %738 = vst [vmem:[%s1592_s4 + $0xb0] sm:$0xff] %v706_v53  ;;  %739 = vst [vmem:[%s1592_s4 + $0xb8] sm:$0xff] %v707_v57  ;;  %1071 = vrsqrt.f32 %v666_v49  ;;  %v651_v54 = vpop.xlane.xlu1 %650 }
 0x220   : > { %v1062_v58 = vpop.eup %1061  ;;  %724 = vst [vmem:[%s1592_s4 + $0x40] sm:$0xff] %v692_v50  ;;  %725 = vst [vmem:[%s1592_s4 + $0x48] sm:$0xff] %v693_v52  ;;  %v667_v60 = vmax.f32 %v651_v54, 1e-24 }
 0x221   : > { %v1064_v4 = vpop.eup %1063  ;;  %v694_v8 = vmul.f32 %v1062_v58, %v1523_v31  ;;  %v695_v14 = vmul.f32 %v1062_v58, %v1530_v38 }
 0x222   : > { %v708_v19 = vmul.f32 %v1064_v4, %v1510_v16  ;;  %v709_v63 = vmul.f32 %v1064_v4, %v1518_v23  ;;  %1073 = vrsqrt.f32 %v667_v60 }
 0x223   : > { %726 = vst [vmem:[%s1592_s4 + $0x50] sm:$0xff] %v694_v8  ;;  %727 = vst [vmem:[%s1592_s4 + $0x58] sm:$0xff] %v695_v14 }
 0x224   : > { %v1066_v2 = vpop.eup %1065  ;;  %740 = vst [vmem:[%s1592_s4 + $0xc0] sm:$0xff] %v708_v19  ;;  %741 = vst [vmem:[%s1592_s4 + $0xc8] sm:$0xff] %v709_v63 }
 0x225   : > { %v1068_v3 = vpop.eup %1067  ;;  %v710_v31 = vmul.f32 %v1066_v2, %v1535_v42  ;;  %v711_v38 = vmul.f32 %v1066_v2, %v1538_v43 }
 0x226   : > { %v696_v16 = vmul.f32 %v1068_v3, %v1549_v56  ;;  %v697_v23 = vmul.f32 %v1068_v3, %v1555_v62 }
 0x227   : > { %742 = vst [vmem:[%s1592_s4 + $0xd0] sm:$0xff] %v710_v31  ;;  %743 = vst [vmem:[%s1592_s4 + $0xd8] sm:$0xff] %v711_v38 }
 0x228   : > { %v1070_v5 = vpop.eup %1069  ;;  %728 = vst [vmem:[%s1592_s4 + $0x60] sm:$0xff] %v696_v16  ;;  %729 = vst [vmem:[%s1592_s4 + $0x68] sm:$0xff] %v697_v23 }
 0x229   : > { %v1072_v7 = vpop.eup %1071  ;;  %v698_v9 = vmul.f32 %v1070_v5, %v1563_v6  ;;  %v699_v42 = vmul.f32 %v1070_v5, %v1570_v12 }
 0x22a   : > { %v712_v43 = vmul.f32 %v1072_v7, %v1552_v59  ;;  %v713_v56 = vmul.f32 %v1072_v7, %v1558_v0 }
 0x22b   : > { %730 = vst [vmem:[%s1592_s4 + $0x70] sm:$0xff] %v698_v9  ;;  %731 = vst [vmem:[%s1592_s4 + $0x78] sm:$0xff] %v699_v42 }
 0x22c   : > { %v1074_v62 = vpop.eup %1073  ;;  %744 = vst [vmem:[%s1592_s4 + $0xe0] sm:$0xff] %v712_v43  ;;  %745 = vst [vmem:[%s1592_s4 + $0xe8] sm:$0xff] %v713_v56 }
 0x22d   : > { %v714_v59 = vmul.f32 %v1074_v62, %v1575_v15  ;;  %v715_v6 = vmul.f32 %v1074_v62, %v1582_v24 }
 0x22f   : > { %746 = vst [vmem:[%s1592_s4 + $0xf0] sm:$0xff] %v714_v59  ;;  %747 = vst [vmem:[%s1592_s4 + $0xf8] sm:$0xff] %v715_v6 }
 0x230   : > { %1146 = shalt.err (!%p1143_p7)
}
 0x231   : > { %s1147_s30 = scalar_lea.hbm %s1657_s11, 4096  ;;  %s1151_s8 = scalar_lea.hbm %s1710_s3, 8192 }
 0x232   : > { %p1148_p9 = scmp.ne.s32.totalorder %s1657_s11, %s1147_s30  ;;  %p1152_p5 = scmp.lt.u32.totalorder %s1657_s11, %s1710_s3 }
 0x233   : > { %p1153_p11 = scmp.lt.u32.totalorder %s1151_s8, %s1147_s30  ;;  %p1155_p4 = scmp.lt.u32.totalorder %s1147_s30, %s1657_s11 }
 0x234   : > { %p1149_p2 = pnand %p1148_p9, %p1325_p12 }
 0x235   : > { %p1154_p1 = por %p1153_p11, %p1152_p5 }
 0x236   : > { %p1150_p0 = pneg %p1149_p2 }
 0x237   : > { %p1156_p6 = por %p1155_p4, %p1154_p1 }
 0x239   : > { %p1157_p8 = pnand %p1156_p6, %p1150_p0 }
 0x23b   : > { %1160 = shalt.err (!%p1157_p8)
}
 0x23c   : > { %s1212_s20 = smov 256   ;;  %s1213_s4 = smov 16  }
 0x23d   : > { %938 = dma.vmem_to_hbm [thread:$0]  (%p1325_p12), %s1659_s26, 4096, %s1657_s11, %s749_s16, %s1212_s20, %s1212_s20, %s1213_s4  }
 0x23e PF: > { %s778_s25 = sand.u32 1, %s1191_s12   ;;  %p1725_p10 = scmp.ne.s32.totalorder %s1715_s19, 0 }
 0x23f   : > { %p1726_p13 = scmp.ge.s32.totalorder %s1203_s15, 2  ;;  %s779_s5 = scalar_lea.sflag [#allocation4], %s778_s25 }
 0x241   : > { %p949_p3 = pnand %p1726_p13, %p1725_p10 }
 0x243   : > { %1186 = dma.done.wait (!%p949_p3), %s779_s5, 4096  }
 0x244   : > { %1188 = vsyncadd (!%p949_p3), %s779_s5, 4294963200  ;;  %p17_p7 = scmp.ge.s32.totalorder %s1290_s24, 4   ;;  %s1727_s12 = smov %s1195_s13 }
 0x245   : > { %s1728_s13 = smov %s1199_s14  ;;  %s1729_s14 = smov %s1321_s17 }
 0x246   : > { %s1730_s15 = smov %s1290_s24  ;;  %19 = sbr.rel (!%p17_p7) target bundleno = 6 (0x6), region = 81 }
 0x24d   :  { %784 = vsyncpa [#allocation3], 1 }
 0x24e   :  { %786 = vsyncpa [#allocation3 + $0x1], 1 }
 0x24f   :  { %787 = vsyncpa [#allocation6], 1 }
 0x250   :  { %788 = vsyncpa [#allocation4], 1 }
 0x251   :  { %790 = vsyncpa [#allocation4 + $0x1], 1 }

</bundles_post_ra>
